<compile_context>
chip_gen: v6e
topology: v6e:2x2x1
jax: 0.10.0
libtpu: 0.0.40
codegen_flags: <defaults>
</compile_context>

<pallas_src>
import functools

import jax
import jax.numpy as jnp
from jax import lax
from jax.experimental import pallas as pl
from jax.experimental.pallas import tpu as pltpu


def _command_lstm_kernel(x_ref, h0_ref, wih_ref, whh_ref, b_ref,
                         wout_ref, bout_ref, out_ref, *,
                         seq_len, batch, hidden):
    T, B, H = seq_len, batch, hidden

    # ---- Hoisted input projection (no sequential dependence): one MXU op ----
    # x_ref is time-major (T*B, E); gx is (T*B, 4H) with 4H lane-dense.
    gx = (jnp.dot(x_ref[...], wih_ref[...],
                  preferred_element_type=jnp.float32)
          + b_ref[...])                                                 # (T*B, 4H)

    whh = whh_ref[...]                                                  # (H, 4H)

    # h0 = c0 = encoded observation (PyTorch: (hid_t, hid_t)).
    h = h0_ref[...]                                                     # (B, H)
    c = h0_ref[...]                                                     # (B, H)

    # Lane mask selecting the g-gate block (tanh); i/f/o blocks use sigmoid.
    lane = lax.broadcasted_iota(jnp.int32, (B, 4 * H), 1)
    is_g = (lane >= 2 * H) & (lane < 3 * H)
    half = jnp.float32(0.5)

    hs = []
    # Sequential recurrence, fully unrolled at trace time (T is small/static).
    for t in range(T):
        gates = gx[t * B:(t + 1) * B, :] + jnp.dot(
            h, whh, preferred_element_type=jnp.float32)                 # (B, 4H)

        # One EUP tanh for all four gates:
        #   sigmoid(x) = 0.5 * (1 + tanh(x / 2))
        pre = jnp.where(is_g, gates, gates * half)
        th = jnp.tanh(pre)
        act = jnp.where(is_g, th, half * th + half)

        i_g = act[:, 0 * H:1 * H]
        f_g = act[:, 1 * H:2 * H]
        g_g = act[:, 2 * H:3 * H]
        o_g = act[:, 3 * H:4 * H]

        c = f_g * c + i_g * g_g
        h = o_g * jnp.tanh(c)
        hs.append(h)                          # register-carried, no VMEM scratch

    # ---- Batched output projection (nn.Linear), time-major (T*B, D) ----
    h_all = jnp.concatenate(hs, axis=0)                                 # (T*B, H)
    out = (jnp.dot(h_all, wout_ref[...], preferred_element_type=jnp.float32)
           + bout_ref[...])                                             # (T*B, D)
    out_ref[...] = out


def command_model_forward(input_seq, obs_t, params):
    """input_seq: (B, T, E) float32 (already-embedded tokens), obs_t: (B, H) float32."""
    B, T, E = input_seq.shape
    H = obs_t.shape[1]
    D = params["w_out"].shape[1]

    # Time-major, 2-D (lane/row friendly) input layout for the kernel.
    x_tm = jnp.transpose(input_seq.astype(jnp.float32), (1, 0, 2)).reshape(T * B, E)

    full = lambda shape: pl.BlockSpec(shape, lambda i: tuple(0 for _ in shape))

    flops = 2 * T * B * (E * 4 * H + H * 4 * H + H * D) + 12 * T * B * H
    transcendentals = T * B * (4 * H + H)
    bytes_accessed = 4 * (T * B * E + B * H + E * 4 * H + H * 4 * H + 4 * H
                          + H * D + D + T * B * D)

    out_tm = pl.pallas_call(
        functools.partial(_command_lstm_kernel, seq_len=T, batch=B, hidden=H),
        out_shape=jax.ShapeDtypeStruct((T * B, D), jnp.float32),
        grid_spec=pltpu.PrefetchScalarGridSpec(
            num_scalar_prefetch=0,
            grid=(1,),                                   # single invocation
            in_specs=[
                full((T * B, E)),                        # time-major embedded inputs
                full((B, H)),                            # obs_t (h0 = c0)
                full((E, 4 * H)),                        # W_ih^T
                full((H, 4 * H)),                        # W_hh^T
                full((1, 4 * H)),                        # b_ih + b_hh
                full((H, D)),                            # W_out^T
                full((1, D)),                            # b_out
            ],
            out_specs=full((T * B, D)),
        ),
        compiler_params=pltpu.CompilerParams(
            dimension_semantics=("arbitrary",)),
        cost_estimate=pl.CostEstimate(flops=flops,
                                      transcendentals=transcendentals,
                                      bytes_accessed=bytes_accessed),
    )(x_tm,
      obs_t.astype(jnp.float32),
      params["w_ih"], params["w_hh"], params["b"],
      params["w_out"], params["b_out"])

    # Back to batch-first (B, T, D) — tiny layout plumbing outside the kernel.
    return jnp.transpose(out_tm.reshape(T, B, D), (1, 0, 2))


def reference_forward(input_seq, obs_t, params):
    """Pure-JAX reference (lax.scan LSTM) for correctness checking."""
    H = obs_t.shape[1]
    x_tm = jnp.transpose(input_seq, (1, 0, 2))

    def step(carry, x_t):
        h, c = carry
        gates = x_t @ params["w_ih"] + h @ params["w_hh"] + params["b"][0]
        i_g = jax.nn.sigmoid(gates[:, 0 * H:1 * H])
        f_g = jax.nn.sigmoid(gates[:, 1 * H:2 * H])
        g_g = jnp.tanh(gates[:, 2 * H:3 * H])
        o_g = jax.nn.sigmoid(gates[:, 3 * H:4 * H])
        c_new = f_g * c + i_g * g_g
        h_new = o_g * jnp.tanh(c_new)
        return (h_new, c_new), h_new

    _, hs = lax.scan(step, (obs_t, obs_t), x_tm)
    out = hs @ params["w_out"] + params["b_out"][0]
    return jnp.transpose(out, (1, 0, 2))


def make_params(key, emb_dim, obs_size, dict_size):
    """Deterministic synthetic parameters with PyTorch LSTM/Linear shapes (transposed)."""
    ks = jax.random.split(key, 6)
    s = 0.1
    return {
        # PyTorch weight_ih_l0 is (4H, E); we store the transpose (E, 4H).
        "w_ih": jax.random.uniform(ks[0], (emb_dim, 4 * obs_size), jnp.float32, -s, s),
        "w_hh": jax.random.uniform(ks[1], (obs_size, 4 * obs_size), jnp.float32, -s, s),
        # b = bias_ih + bias_hh, kept as a single (1, 4H) row.
        "b": jax.random.uniform(ks[2], (1, 4 * obs_size), jnp.float32, -s, s),
        # nn.Linear(obs_size, dict_size): weight (D, H) -> stored as (H, D).
        "w_out": jax.random.uniform(ks[3], (obs_size, dict_size), jnp.float32, -s, s),
        "b_out": jax.random.uniform(ks[4], (1, dict_size), jnp.float32, -s, s),
    }


if __name__ == "__main__":
    # Small shapes consistent with CommandModel.forward:
    B, T = 2, 8            # batch, sequence length
    E = 16                 # embeddings.embedding_dim
    H = 32                 # obs_size (LSTM hidden size)
    D = 64                 # dict_size

    key = jax.random.PRNGKey(0)
    k_x, k_h, k_p = jax.random.split(key, 3)

    input_seq = jax.random.normal(k_x, (B, T, E), jnp.float32)   # embedded token sequence
    obs_t = jax.random.normal(k_h, (B, H), jnp.float32)          # encoded observation
    params = make_params(k_p, E, H, D)

    out = jax.block_until_ready(command_model_forward(input_seq, obs_t, params))
    ref = jax.block_until_ready(reference_forward(input_seq, obs_t, params))

    assert out.shape == (B, T, D), out.shape
    assert jnp.allclose(out, ref, atol=1e-4, rtol=1e-4), "mismatch vs reference"
    print("KERNEL_OK")
</pallas_src>

<mosaic_0001>
module attributes {stable_mosaic.version = 11 : i64} {
  func.func @_command_lstm_kernel(%arg0: i32, %arg1: memref<16x16xf32, #tpu.memory_space<vmem>>, %arg2: memref<2x32xf32, #tpu.memory_space<vmem>>, %arg3: memref<16x128xf32, #tpu.memory_space<vmem>>, %arg4: memref<32x128xf32, #tpu.memory_space<vmem>>, %arg5: memref<1x128xf32, #tpu.memory_space<vmem>>, %arg6: memref<32x64xf32, #tpu.memory_space<vmem>>, %arg7: memref<1x64xf32, #tpu.memory_space<vmem>>, %arg8: memref<16x64xf32, #tpu.memory_space<vmem>>) attributes {dimension_semantics = [#tpu.dimension_semantics<arbitrary>], iteration_bounds = array<i64: 1>, scalar_prefetch = 0 : i64, scratch_operands = 0 : i64, tpu.core_type = #tpu.core_type<tc>, window_params = [{pipeline_mode = #tpu.pipeline_mode<synchronous>, transform_indices = @transform_0, window_bounds = array<i64: 16, 16>}, {pipeline_mode = #tpu.pipeline_mode<synchronous>, transform_indices = @transform_1, window_bounds = array<i64: 2, 32>}, {pipeline_mode = #tpu.pipeline_mode<synchronous>, transform_indices = @transform_2, window_bounds = array<i64: 16, 128>}, {pipeline_mode = #tpu.pipeline_mode<synchronous>, transform_indices = @transform_3, window_bounds = array<i64: 32, 128>}, {pipeline_mode = #tpu.pipeline_mode<synchronous>, transform_indices = @transform_4, window_bounds = array<i64: 1, 128>}, {pipeline_mode = #tpu.pipeline_mode<synchronous>, transform_indices = @transform_5, window_bounds = array<i64: 32, 64>}, {pipeline_mode = #tpu.pipeline_mode<synchronous>, transform_indices = @transform_6, window_bounds = array<i64: 1, 64>}, {pipeline_mode = #tpu.pipeline_mode<synchronous>, transform_indices = @transform_7, window_bounds = array<i64: 16, 64>}]} {
    %c0 = arith.constant 0 : index
    %c0_0 = arith.constant 0 : index
    %0 = vector.load %arg1[%c0, %c0_0] : memref<16x16xf32, #tpu.memory_space<vmem>>, vector<16x16xf32>
    %c0_1 = arith.constant 0 : index
    %c0_2 = arith.constant 0 : index
    %1 = vector.load %arg3[%c0_1, %c0_2] : memref<16x128xf32, #tpu.memory_space<vmem>>, vector<16x128xf32>
    %cst = arith.constant dense<0.000000e+00> : vector<16x128xf32>
    %2 = tpu.matmul %0, %1, %cst {dimension_numbers = #tpu.dot_dimension_numbers<[1], [0], [0], [1], [0, 0, 1, 1], [], []>} : vector<16x16xf32>, vector<16x128xf32>, vector<16x128xf32> -> vector<16x128xf32>
    %c0_3 = arith.constant 0 : index
    %c0_4 = arith.constant 0 : index
    %3 = vector.load %arg5[%c0_3, %c0_4] : memref<1x128xf32, #tpu.memory_space<vmem>>, vector<1x128xf32>
    %4 = vector.broadcast %3 : vector<1x128xf32> to vector<16x128xf32>
    %5 = arith.addf %2, %4 : vector<16x128xf32>
    %c0_5 = arith.constant 0 : index
    %c0_6 = arith.constant 0 : index
    %6 = vector.load %arg4[%c0_5, %c0_6] : memref<32x128xf32, #tpu.memory_space<vmem>>, vector<32x128xf32>
    %c0_7 = arith.constant 0 : index
    %c0_8 = arith.constant 0 : index
    %7 = vector.load %arg2[%c0_7, %c0_8] : memref<2x32xf32, #tpu.memory_space<vmem>>, vector<2x32xf32>
    %c0_9 = arith.constant 0 : index
    %c0_10 = arith.constant 0 : index
    %8 = vector.load %arg2[%c0_9, %c0_10] : memref<2x32xf32, #tpu.memory_space<vmem>>, vector<2x32xf32>
    %9 = tpu.iota {dimensions = array<i32: 1>} : vector<2x128xi32>
    %c64_i32 = arith.constant 64 : i32
    %10 = vector.broadcast %c64_i32 : i32 to vector<2x128xi32>
    %11 = arith.cmpi sge, %9, %10 : vector<2x128xi32>
    %c96_i32 = arith.constant 96 : i32
    %12 = vector.broadcast %c96_i32 : i32 to vector<2x128xi32>
    %13 = arith.cmpi slt, %9, %12 : vector<2x128xi32>
    %14 = arith.andi %11, %13 : vector<2x128xi1>
    %15 = vector.extract_strided_slice %5 {offsets = [0, 0], sizes = [2, 128], strides = [1, 1]} : vector<16x128xf32> to vector<2x128xf32>
    %cst_11 = arith.constant dense<0.000000e+00> : vector<2x128xf32>
    %16 = tpu.matmul %7, %6, %cst_11 {dimension_numbers = #tpu.dot_dimension_numbers<[1], [0], [0], [1], [0, 0, 1, 1], [], []>} : vector<2x32xf32>, vector<32x128xf32>, vector<2x128xf32> -> vector<2x128xf32>
    %17 = arith.addf %15, %16 : vector<2x128xf32>
    %cst_12 = arith.constant 5.000000e-01 : f32
    %18 = vector.broadcast %cst_12 : f32 to vector<2x128xf32>
    %19 = arith.mulf %17, %18 : vector<2x128xf32>
    %20 = arith.select %14, %17, %19 : vector<2x128xi1>, vector<2x128xf32>
    %21 = math.tanh %20 : vector<2x128xf32>
    %cst_13 = arith.constant 5.000000e-01 : f32
    %22 = vector.broadcast %cst_13 : f32 to vector<2x128xf32>
    %23 = arith.mulf %22, %21 : vector<2x128xf32>
    %cst_14 = arith.constant 5.000000e-01 : f32
    %24 = vector.broadcast %cst_14 : f32 to vector<2x128xf32>
    %25 = arith.addf %23, %24 : vector<2x128xf32>
    %26 = arith.select %14, %21, %25 : vector<2x128xi1>, vector<2x128xf32>
    %27 = vector.extract_strided_slice %26 {offsets = [0, 0], sizes = [2, 32], strides = [1, 1]} : vector<2x128xf32> to vector<2x32xf32>
    %28 = vector.extract_strided_slice %26 {offsets = [0, 32], sizes = [2, 32], strides = [1, 1]} : vector<2x128xf32> to vector<2x32xf32>
    %29 = vector.extract_strided_slice %26 {offsets = [0, 64], sizes = [2, 32], strides = [1, 1]} : vector<2x128xf32> to vector<2x32xf32>
    %30 = vector.extract_strided_slice %26 {offsets = [0, 96], sizes = [2, 32], strides = [1, 1]} : vector<2x128xf32> to vector<2x32xf32>
    %31 = arith.mulf %28, %8 : vector<2x32xf32>
    %32 = arith.mulf %27, %29 : vector<2x32xf32>
    %33 = arith.addf %31, %32 : vector<2x32xf32>
    %34 = math.tanh %33 : vector<2x32xf32>
    %35 = arith.mulf %30, %34 : vector<2x32xf32>
    %36 = vector.extract_strided_slice %5 {offsets = [2, 0], sizes = [2, 128], strides = [1, 1]} : vector<16x128xf32> to vector<2x128xf32>
    %cst_15 = arith.constant dense<0.000000e+00> : vector<2x128xf32>
    %37 = tpu.matmul %35, %6, %cst_15 {dimension_numbers = #tpu.dot_dimension_numbers<[1], [0], [0], [1], [0, 0, 1, 1], [], []>} : vector<2x32xf32>, vector<32x128xf32>, vector<2x128xf32> -> vector<2x128xf32>
    %38 = arith.addf %36, %37 : vector<2x128xf32>
    %cst_16 = arith.constant 5.000000e-01 : f32
    %39 = vector.broadcast %cst_16 : f32 to vector<2x128xf32>
    %40 = arith.mulf %38, %39 : vector<2x128xf32>
    %41 = arith.select %14, %38, %40 : vector<2x128xi1>, vector<2x128xf32>
    %42 = math.tanh %41 : vector<2x128xf32>
    %cst_17 = arith.constant 5.000000e-01 : f32
    %43 = vector.broadcast %cst_17 : f32 to vector<2x128xf32>
    %44 = arith.mulf %43, %42 : vector<2x128xf32>
    %cst_18 = arith.constant 5.000000e-01 : f32
    %45 = vector.broadcast %cst_18 : f32 to vector<2x128xf32>
    %46 = arith.addf %44, %45 : vector<2x128xf32>
    %47 = arith.select %14, %42, %46 : vector<2x128xi1>, vector<2x128xf32>
    %48 = vector.extract_strided_slice %47 {offsets = [0, 0], sizes = [2, 32], strides = [1, 1]} : vector<2x128xf32> to vector<2x32xf32>
    %49 = vector.extract_strided_slice %47 {offsets = [0, 32], sizes = [2, 32], strides = [1, 1]} : vector<2x128xf32> to vector<2x32xf32>
    %50 = vector.extract_strided_slice %47 {offsets = [0, 64], sizes = [2, 32], strides = [1, 1]} : vector<2x128xf32> to vector<2x32xf32>
    %51 = vector.extract_strided_slice %47 {offsets = [0, 96], sizes = [2, 32], strides = [1, 1]} : vector<2x128xf32> to vector<2x32xf32>
    %52 = arith.mulf %49, %33 : vector<2x32xf32>
    %53 = arith.mulf %48, %50 : vector<2x32xf32>
    %54 = arith.addf %52, %53 : vector<2x32xf32>
    %55 = math.tanh %54 : vector<2x32xf32>
    %56 = arith.mulf %51, %55 : vector<2x32xf32>
    %57 = vector.extract_strided_slice %5 {offsets = [4, 0], sizes = [2, 128], strides = [1, 1]} : vector<16x128xf32> to vector<2x128xf32>
    %cst_19 = arith.constant dense<0.000000e+00> : vector<2x128xf32>
    %58 = tpu.matmul %56, %6, %cst_19 {dimension_numbers = #tpu.dot_dimension_numbers<[1], [0], [0], [1], [0, 0, 1, 1], [], []>} : vector<2x32xf32>, vector<32x128xf32>, vector<2x128xf32> -> vector<2x128xf32>
    %59 = arith.addf %57, %58 : vector<2x128xf32>
    %cst_20 = arith.constant 5.000000e-01 : f32
    %60 = vector.broadcast %cst_20 : f32 to vector<2x128xf32>
    %61 = arith.mulf %59, %60 : vector<2x128xf32>
    %62 = arith.select %14, %59, %61 : vector<2x128xi1>, vector<2x128xf32>
    %63 = math.tanh %62 : vector<2x128xf32>
    %cst_21 = arith.constant 5.000000e-01 : f32
    %64 = vector.broadcast %cst_21 : f32 to vector<2x128xf32>
    %65 = arith.mulf %64, %63 : vector<2x128xf32>
    %cst_22 = arith.constant 5.000000e-01 : f32
    %66 = vector.broadcast %cst_22 : f32 to vector<2x128xf32>
    %67 = arith.addf %65, %66 : vector<2x128xf32>
    %68 = arith.select %14, %63, %67 : vector<2x128xi1>, vector<2x128xf32>
    %69 = vector.extract_strided_slice %68 {offsets = [0, 0], sizes = [2, 32], strides = [1, 1]} : vector<2x128xf32> to vector<2x32xf32>
    %70 = vector.extract_strided_slice %68 {offsets = [0, 32], sizes = [2, 32], strides = [1, 1]} : vector<2x128xf32> to vector<2x32xf32>
    %71 = vector.extract_strided_slice %68 {offsets = [0, 64], sizes = [2, 32], strides = [1, 1]} : vector<2x128xf32> to vector<2x32xf32>
    %72 = vector.extract_strided_slice %68 {offsets = [0, 96], sizes = [2, 32], strides = [1, 1]} : vector<2x128xf32> to vector<2x32xf32>
    %73 = arith.mulf %70, %54 : vector<2x32xf32>
    %74 = arith.mulf %69, %71 : vector<2x32xf32>
    %75 = arith.addf %73, %74 : vector<2x32xf32>
    %76 = math.tanh %75 : vector<2x32xf32>
    %77 = arith.mulf %72, %76 : vector<2x32xf32>
    %78 = vector.extract_strided_slice %5 {offsets = [6, 0], sizes = [2, 128], strides = [1, 1]} : vector<16x128xf32> to vector<2x128xf32>
    %cst_23 = arith.constant dense<0.000000e+00> : vector<2x128xf32>
    %79 = tpu.matmul %77, %6, %cst_23 {dimension_numbers = #tpu.dot_dimension_numbers<[1], [0], [0], [1], [0, 0, 1, 1], [], []>} : vector<2x32xf32>, vector<32x128xf32>, vector<2x128xf32> -> vector<2x128xf32>
    %80 = arith.addf %78, %79 : vector<2x128xf32>
    %cst_24 = arith.constant 5.000000e-01 : f32
    %81 = vector.broadcast %cst_24 : f32 to vector<2x128xf32>
    %82 = arith.mulf %80, %81 : vector<2x128xf32>
    %83 = arith.select %14, %80, %82 : vector<2x128xi1>, vector<2x128xf32>
    %84 = math.tanh %83 : vector<2x128xf32>
    %cst_25 = arith.constant 5.000000e-01 : f32
    %85 = vector.broadcast %cst_25 : f32 to vector<2x128xf32>
    %86 = arith.mulf %85, %84 : vector<2x128xf32>
    %cst_26 = arith.constant 5.000000e-01 : f32
    %87 = vector.broadcast %cst_26 : f32 to vector<2x128xf32>
    %88 = arith.addf %86, %87 : vector<2x128xf32>
    %89 = arith.select %14, %84, %88 : vector<2x128xi1>, vector<2x128xf32>
    %90 = vector.extract_strided_slice %89 {offsets = [0, 0], sizes = [2, 32], strides = [1, 1]} : vector<2x128xf32> to vector<2x32xf32>
    %91 = vector.extract_strided_slice %89 {offsets = [0, 32], sizes = [2, 32], strides = [1, 1]} : vector<2x128xf32> to vector<2x32xf32>
    %92 = vector.extract_strided_slice %89 {offsets = [0, 64], sizes = [2, 32], strides = [1, 1]} : vector<2x128xf32> to vector<2x32xf32>
    %93 = vector.extract_strided_slice %89 {offsets = [0, 96], sizes = [2, 32], strides = [1, 1]} : vector<2x128xf32> to vector<2x32xf32>
    %94 = arith.mulf %91, %75 : vector<2x32xf32>
    %95 = arith.mulf %90, %92 : vector<2x32xf32>
    %96 = arith.addf %94, %95 : vector<2x32xf32>
    %97 = math.tanh %96 : vector<2x32xf32>
    %98 = arith.mulf %93, %97 : vector<2x32xf32>
    %99 = vector.extract_strided_slice %5 {offsets = [8, 0], sizes = [2, 128], strides = [1, 1]} : vector<16x128xf32> to vector<2x128xf32>
    %cst_27 = arith.constant dense<0.000000e+00> : vector<2x128xf32>
    %100 = tpu.matmul %98, %6, %cst_27 {dimension_numbers = #tpu.dot_dimension_numbers<[1], [0], [0], [1], [0, 0, 1, 1], [], []>} : vector<2x32xf32>, vector<32x128xf32>, vector<2x128xf32> -> vector<2x128xf32>
    %101 = arith.addf %99, %100 : vector<2x128xf32>
    %cst_28 = arith.constant 5.000000e-01 : f32
    %102 = vector.broadcast %cst_28 : f32 to vector<2x128xf32>
    %103 = arith.mulf %101, %102 : vector<2x128xf32>
    %104 = arith.select %14, %101, %103 : vector<2x128xi1>, vector<2x128xf32>
    %105 = math.tanh %104 : vector<2x128xf32>
    %cst_29 = arith.constant 5.000000e-01 : f32
    %106 = vector.broadcast %cst_29 : f32 to vector<2x128xf32>
    %107 = arith.mulf %106, %105 : vector<2x128xf32>
    %cst_30 = arith.constant 5.000000e-01 : f32
    %108 = vector.broadcast %cst_30 : f32 to vector<2x128xf32>
    %109 = arith.addf %107, %108 : vector<2x128xf32>
    %110 = arith.select %14, %105, %109 : vector<2x128xi1>, vector<2x128xf32>
    %111 = vector.extract_strided_slice %110 {offsets = [0, 0], sizes = [2, 32], strides = [1, 1]} : vector<2x128xf32> to vector<2x32xf32>
    %112 = vector.extract_strided_slice %110 {offsets = [0, 32], sizes = [2, 32], strides = [1, 1]} : vector<2x128xf32> to vector<2x32xf32>
    %113 = vector.extract_strided_slice %110 {offsets = [0, 64], sizes = [2, 32], strides = [1, 1]} : vector<2x128xf32> to vector<2x32xf32>
    %114 = vector.extract_strided_slice %110 {offsets = [0, 96], sizes = [2, 32], strides = [1, 1]} : vector<2x128xf32> to vector<2x32xf32>
    %115 = arith.mulf %112, %96 : vector<2x32xf32>
    %116 = arith.mulf %111, %113 : vector<2x32xf32>
    %117 = arith.addf %115, %116 : vector<2x32xf32>
    %118 = math.tanh %117 : vector<2x32xf32>
    %119 = arith.mulf %114, %118 : vector<2x32xf32>
    %120 = vector.extract_strided_slice %5 {offsets = [10, 0], sizes = [2, 128], strides = [1, 1]} : vector<16x128xf32> to vector<2x128xf32>
    %cst_31 = arith.constant dense<0.000000e+00> : vector<2x128xf32>
    %121 = tpu.matmul %119, %6, %cst_31 {dimension_numbers = #tpu.dot_dimension_numbers<[1], [0], [0], [1], [0, 0, 1, 1], [], []>} : vector<2x32xf32>, vector<32x128xf32>, vector<2x128xf32> -> vector<2x128xf32>
    %122 = arith.addf %120, %121 : vector<2x128xf32>
    %cst_32 = arith.constant 5.000000e-01 : f32
    %123 = vector.broadcast %cst_32 : f32 to vector<2x128xf32>
    %124 = arith.mulf %122, %123 : vector<2x128xf32>
    %125 = arith.select %14, %122, %124 : vector<2x128xi1>, vector<2x128xf32>
    %126 = math.tanh %125 : vector<2x128xf32>
    %cst_33 = arith.constant 5.000000e-01 : f32
    %127 = vector.broadcast %cst_33 : f32 to vector<2x128xf32>
    %128 = arith.mulf %127, %126 : vector<2x128xf32>
    %cst_34 = arith.constant 5.000000e-01 : f32
    %129 = vector.broadcast %cst_34 : f32 to vector<2x128xf32>
    %130 = arith.addf %128, %129 : vector<2x128xf32>
    %131 = arith.select %14, %126, %130 : vector<2x128xi1>, vector<2x128xf32>
    %132 = vector.extract_strided_slice %131 {offsets = [0, 0], sizes = [2, 32], strides = [1, 1]} : vector<2x128xf32> to vector<2x32xf32>
    %133 = vector.extract_strided_slice %131 {offsets = [0, 32], sizes = [2, 32], strides = [1, 1]} : vector<2x128xf32> to vector<2x32xf32>
    %134 = vector.extract_strided_slice %131 {offsets = [0, 64], sizes = [2, 32], strides = [1, 1]} : vector<2x128xf32> to vector<2x32xf32>
    %135 = vector.extract_strided_slice %131 {offsets = [0, 96], sizes = [2, 32], strides = [1, 1]} : vector<2x128xf32> to vector<2x32xf32>
    %136 = arith.mulf %133, %117 : vector<2x32xf32>
    %137 = arith.mulf %132, %134 : vector<2x32xf32>
    %138 = arith.addf %136, %137 : vector<2x32xf32>
    %139 = math.tanh %138 : vector<2x32xf32>
    %140 = arith.mulf %135, %139 : vector<2x32xf32>
    %141 = vector.extract_strided_slice %5 {offsets = [12, 0], sizes = [2, 128], strides = [1, 1]} : vector<16x128xf32> to vector<2x128xf32>
    %cst_35 = arith.constant dense<0.000000e+00> : vector<2x128xf32>
    %142 = tpu.matmul %140, %6, %cst_35 {dimension_numbers = #tpu.dot_dimension_numbers<[1], [0], [0], [1], [0, 0, 1, 1], [], []>} : vector<2x32xf32>, vector<32x128xf32>, vector<2x128xf32> -> vector<2x128xf32>
    %143 = arith.addf %141, %142 : vector<2x128xf32>
    %cst_36 = arith.constant 5.000000e-01 : f32
    %144 = vector.broadcast %cst_36 : f32 to vector<2x128xf32>
    %145 = arith.mulf %143, %144 : vector<2x128xf32>
    %146 = arith.select %14, %143, %145 : vector<2x128xi1>, vector<2x128xf32>
    %147 = math.tanh %146 : vector<2x128xf32>
    %cst_37 = arith.constant 5.000000e-01 : f32
    %148 = vector.broadcast %cst_37 : f32 to vector<2x128xf32>
    %149 = arith.mulf %148, %147 : vector<2x128xf32>
    %cst_38 = arith.constant 5.000000e-01 : f32
    %150 = vector.broadcast %cst_38 : f32 to vector<2x128xf32>
    %151 = arith.addf %149, %150 : vector<2x128xf32>
    %152 = arith.select %14, %147, %151 : vector<2x128xi1>, vector<2x128xf32>
    %153 = vector.extract_strided_slice %152 {offsets = [0, 0], sizes = [2, 32], strides = [1, 1]} : vector<2x128xf32> to vector<2x32xf32>
    %154 = vector.extract_strided_slice %152 {offsets = [0, 32], sizes = [2, 32], strides = [1, 1]} : vector<2x128xf32> to vector<2x32xf32>
    %155 = vector.extract_strided_slice %152 {offsets = [0, 64], sizes = [2, 32], strides = [1, 1]} : vector<2x128xf32> to vector<2x32xf32>
    %156 = vector.extract_strided_slice %152 {offsets = [0, 96], sizes = [2, 32], strides = [1, 1]} : vector<2x128xf32> to vector<2x32xf32>
    %157 = arith.mulf %154, %138 : vector<2x32xf32>
    %158 = arith.mulf %153, %155 : vector<2x32xf32>
    %159 = arith.addf %157, %158 : vector<2x32xf32>
    %160 = math.tanh %159 : vector<2x32xf32>
    %161 = arith.mulf %156, %160 : vector<2x32xf32>
    %162 = vector.extract_strided_slice %5 {offsets = [14, 0], sizes = [2, 128], strides = [1, 1]} : vector<16x128xf32> to vector<2x128xf32>
    %cst_39 = arith.constant dense<0.000000e+00> : vector<2x128xf32>
    %163 = tpu.matmul %161, %6, %cst_39 {dimension_numbers = #tpu.dot_dimension_numbers<[1], [0], [0], [1], [0, 0, 1, 1], [], []>} : vector<2x32xf32>, vector<32x128xf32>, vector<2x128xf32> -> vector<2x128xf32>
    %164 = arith.addf %162, %163 : vector<2x128xf32>
    %cst_40 = arith.constant 5.000000e-01 : f32
    %165 = vector.broadcast %cst_40 : f32 to vector<2x128xf32>
    %166 = arith.mulf %164, %165 : vector<2x128xf32>
    %167 = arith.select %14, %164, %166 : vector<2x128xi1>, vector<2x128xf32>
    %168 = math.tanh %167 : vector<2x128xf32>
    %cst_41 = arith.constant 5.000000e-01 : f32
    %169 = vector.broadcast %cst_41 : f32 to vector<2x128xf32>
    %170 = arith.mulf %169, %168 : vector<2x128xf32>
    %cst_42 = arith.constant 5.000000e-01 : f32
    %171 = vector.broadcast %cst_42 : f32 to vector<2x128xf32>
    %172 = arith.addf %170, %171 : vector<2x128xf32>
    %173 = arith.select %14, %168, %172 : vector<2x128xi1>, vector<2x128xf32>
    %174 = vector.extract_strided_slice %173 {offsets = [0, 0], sizes = [2, 32], strides = [1, 1]} : vector<2x128xf32> to vector<2x32xf32>
    %175 = vector.extract_strided_slice %173 {offsets = [0, 32], sizes = [2, 32], strides = [1, 1]} : vector<2x128xf32> to vector<2x32xf32>
    %176 = vector.extract_strided_slice %173 {offsets = [0, 64], sizes = [2, 32], strides = [1, 1]} : vector<2x128xf32> to vector<2x32xf32>
    %177 = vector.extract_strided_slice %173 {offsets = [0, 96], sizes = [2, 32], strides = [1, 1]} : vector<2x128xf32> to vector<2x32xf32>
    %178 = arith.mulf %175, %159 : vector<2x32xf32>
    %179 = arith.mulf %174, %176 : vector<2x32xf32>
    %180 = arith.addf %178, %179 : vector<2x32xf32>
    %181 = math.tanh %180 : vector<2x32xf32>
    %182 = arith.mulf %177, %181 : vector<2x32xf32>
    %183 = tpu.concatenate %35, %56, %77, %98, %119, %140, %161, %182 in 0 : vector<2x32xf32>, vector<2x32xf32>, vector<2x32xf32>, vector<2x32xf32>, vector<2x32xf32>, vector<2x32xf32>, vector<2x32xf32>, vector<2x32xf32> -> vector<16x32xf32>
    %c0_43 = arith.constant 0 : index
    %c0_44 = arith.constant 0 : index
    %184 = vector.load %arg6[%c0_43, %c0_44] : memref<32x64xf32, #tpu.memory_space<vmem>>, vector<32x64xf32>
    %cst_45 = arith.constant dense<0.000000e+00> : vector<16x64xf32>
    %185 = tpu.matmul %183, %184, %cst_45 {dimension_numbers = #tpu.dot_dimension_numbers<[1], [0], [0], [1], [0, 0, 1, 1], [], []>} : vector<16x32xf32>, vector<32x64xf32>, vector<16x64xf32> -> vector<16x64xf32>
    %c0_46 = arith.constant 0 : index
    %c0_47 = arith.constant 0 : index
    %186 = vector.load %arg7[%c0_46, %c0_47] : memref<1x64xf32, #tpu.memory_space<vmem>>, vector<1x64xf32>
    %187 = vector.broadcast %186 : vector<1x64xf32> to vector<16x64xf32>
    %188 = arith.addf %185, %187 : vector<16x64xf32>
    %c0_48 = arith.constant 0 : index
    %c0_49 = arith.constant 0 : index
    %189 = vector.load %arg8[%c0_48, %c0_49] : memref<16x64xf32, #tpu.memory_space<vmem>>, vector<16x64xf32>
    tpu.vector_store %arg8[%c0_48, %c0_49], %188 {strides = array<i32>} : memref<16x64xf32, #tpu.memory_space<vmem>>, vector<16x64xf32>,
    return
  }
  func.func @transform_0(%arg0: i32) -> (i32, i32) {
    %c0_i32 = arith.constant 0 : i32
    %c0_i32_0 = arith.constant 0 : i32
    %c0_i32_1 = arith.constant 0 : i32
    return %c0_i32, %c0_i32_0 : i32, i32
  }
  func.func @transform_1(%arg0: i32) -> (i32, i32) {
    %c0_i32 = arith.constant 0 : i32
    %c0_i32_0 = arith.constant 0 : i32
    %c0_i32_1 = arith.constant 0 : i32
    return %c0_i32, %c0_i32_0 : i32, i32
  }
  func.func @transform_2(%arg0: i32) -> (i32, i32) {
    %c0_i32 = arith.constant 0 : i32
    %c0_i32_0 = arith.constant 0 : i32
    %c0_i32_1 = arith.constant 0 : i32
    return %c0_i32, %c0_i32_0 : i32, i32
  }
  func.func @transform_3(%arg0: i32) -> (i32, i32) {
    %c0_i32 = arith.constant 0 : i32
    %c0_i32_0 = arith.constant 0 : i32
    %c0_i32_1 = arith.constant 0 : i32
    return %c0_i32, %c0_i32_0 : i32, i32
  }
  func.func @transform_4(%arg0: i32) -> (i32, i32) {
    %c0_i32 = arith.constant 0 : i32
    %c0_i32_0 = arith.constant 0 : i32
    %c0_i32_1 = arith.constant 0 : i32
    return %c0_i32, %c0_i32_0 : i32, i32
  }
  func.func @transform_5(%arg0: i32) -> (i32, i32) {
    %c0_i32 = arith.constant 0 : i32
    %c0_i32_0 = arith.constant 0 : i32
    %c0_i32_1 = arith.constant 0 : i32
    return %c0_i32, %c0_i32_0 : i32, i32
  }
  func.func @transform_6(%arg0: i32) -> (i32, i32) {
    %c0_i32 = arith.constant 0 : i32
    %c0_i32_0 = arith.constant 0 : i32
    %c0_i32_1 = arith.constant 0 : i32
    return %c0_i32, %c0_i32_0 : i32, i32
  }
  func.func @transform_7(%arg0: i32) -> (i32, i32) {
    %c0_i32 = arith.constant 0 : i32
    %c0_i32_0 = arith.constant 0 : i32
    %c0_i32_1 = arith.constant 0 : i32
    return %c0_i32, %c0_i32_0 : i32, i32
  }
}

</mosaic_0001>

<bundles_post_ra>
// kernel: tpu_custom_call.1
= control target key start
LH: loop header
LB: loop body
LE: loop exit
PB: predicated region body
PF: predicated region fallthrough
CT: control target
= control target key end

     0   :  { %12 = vsyncpa [#allocation3], 0  ;;  %s1791_s0 = inlined_call_operand.hbm [shape: f32[16,16], index: 0, kind: input, shape index: {}]   ;;  %s1792_s1 = inlined_call_operand.hbm [shape: f32[2,32], index: 1, kind: input, shape index: {}]   ;;  %s1793_s2 = inlined_call_operand.hbm [shape: f32[16,128], index: 2, kind: input, shape index: {}]   ;;  %s1794_s3 = inlined_call_operand.hbm [shape: f32[32,128], index: 3, kind: input, shape index: {}]   ;;  %s1795_s4 = inlined_call_operand.vmem [shape: f32[1,128], index: 4, kind: input, shape index: {}]   ;;  %s1796_s5 = inlined_call_operand.hbm [shape: f32[32,64], index: 5, kind: input, shape index: {}]   ;;  %s1797_s6 = inlined_call_operand.vmem [shape: f32[1,64], index: 6, kind: input, shape index: {}]   ;;  %s1798_s7 = inlined_call_operand.hbm [shape: f32[16,64], index: 7, kind: output, shape index: {}]  }
   0x1   :  { %13 = vsyncpa [#allocation6], 0 }
   0x2   :  { %14 = vsyncpa [#allocation9], 0 }
   0x3   :  { %15 = vsyncpa [#allocation4], 0  ;;  %s1503_s24 = smov [#allocation5]  }
   0x4   :  { %s34_s25 = sshll.u32 %s1503_s24, 4  ;;  %s35_s25 = int_to_ptr.vmem [resolvable:$true] %s34_s25 }
   0x5   :  { %s1383_s26 = scalar_lea.vmem %s35_s25, 32  ;;  %p1388_p1 = scmp.lt.s32.totalorder %s35_s25, %s35_s25 }
   0x6   :  { %p1384_p0 = scmp.ne.s32.totalorder %s35_s25, %s1383_s26  ;;  %p1389_p2 = scmp.lt.s32.totalorder %s1383_s26, %s1383_s26 }
   0x8   :  { %p1390_p3 = por %p1389_p2, %p1388_p1 }
   0xa   :  { %p1391_p4 = pnand %p1390_p3, %p1384_p0 }
   0xc   :  { %1394 = shalt.err (!%p1391_p4)
}
   0xd   :  { %37 = dma.hbm_to_vmem [thread:$0]  %s1792_s1, 32, %s35_s25, [#allocation6]  }
   0xe   :  { %s1504_s29 = smov [#allocation8]   ;;  %s1505_s8 = smov [#allocation2]  }
   0xf   :  { %s55_s30 = sshll.u32 %s1504_s29, 4  ;;  %s21_s9 = sshll.u32 %s1505_s8, 4  ;;  %s56_s30 = int_to_ptr.vmem [resolvable:$true] %s55_s30  ;;  %s22_s9 = int_to_ptr.vmem [resolvable:$true] %s21_s9 }
  0x10   :  { %s1403_s10 = scalar_lea.vmem %s56_s30, 512  ;;  %p1408_p6 = scmp.lt.s32.totalorder %s56_s30, %s56_s30 }
  0x11   :  { %p1404_p5 = scmp.ne.s32.totalorder %s56_s30, %s1403_s10  ;;  %p1409_p7 = scmp.lt.s32.totalorder %s1403_s10, %s1403_s10 }
  0x13   :  { %p1410_p8 = por %p1409_p7, %p1408_p6 }
  0x15   :  { %p1411_p9 = pnand %p1410_p8, %p1404_p5 }
  0x17   :  { %1414 = shalt.err (!%p1411_p9)
}
  0x18   :  { %s1506_s11 = smov 128   ;;  %s1507_s12 = smov 8  }
  0x19   :  { %61 = dma.hbm_to_vmem [thread:$0]  %s1794_s3, 512, %s56_s30, [#allocation9], %s1506_s11, %s1506_s11, %s1507_s12  }
  0x1a   :  { %s1423_s1 = scalar_lea.vmem %s22_s9, 256  ;;  %p1428_p11 = scmp.lt.s32.totalorder %s22_s9, %s22_s9 }
  0x1b   :  { %p1424_p10 = scmp.ne.s32.totalorder %s22_s9, %s1423_s1  ;;  %p1429_p12 = scmp.lt.s32.totalorder %s1423_s1, %s1423_s1 }
  0x1d   :  { %p1430_p13 = por %p1429_p12, %p1428_p11 }
  0x1f   :  { %p1431_p0 = pnand %p1430_p13, %p1424_p10 }
  0x21   :  { %1434 = shalt.err (!%p1431_p0)
}
  0x22   :  { %27 = dma.hbm_to_vmem [thread:$0]  %s1791_s0, 256, %s22_s9, [#allocation3], %s1506_s11, %s1506_s11, %s1507_s12  }
  0x23   :  { %s1508_s17 = smov [#allocation7]   ;;  %s1509_s19 = smov [#allocation10]  }
  0x24   :  { %s43_s18 = sshll.u32 %s1508_s17, 4  ;;  %s69_s3 = sshll.u32 %s1509_s19, 4  ;;  %s44_s18 = int_to_ptr.vmem [resolvable:$true] %s43_s18  ;;  %s70_s3 = int_to_ptr.vmem [resolvable:$true] %s69_s3 }
  0x25   :  { %s1443_s20 = scalar_lea.vmem %s44_s18, 256  ;;  %p1448_p2 = scmp.lt.s32.totalorder %s44_s18, %s44_s18 }
  0x26   :  { %p1444_p1 = scmp.ne.s32.totalorder %s44_s18, %s1443_s20  ;;  %p1449_p3 = scmp.lt.s32.totalorder %s1443_s20, %s1443_s20 }
  0x28   :  { %p1450_p4 = por %p1449_p3, %p1448_p2 }
  0x2a   :  { %p1451_p5 = pnand %p1450_p4, %p1444_p1 }
  0x2c   :  { %1454 = shalt.err (!%p1451_p5)
}
  0x2d   :  { %49 = dma.hbm_to_vmem [thread:$0]  %s1793_s2, 256, %s44_s18, [#allocation6], %s1506_s11, %s1506_s11, %s1507_s12  }
  0x2e   :  { %s1463_s0 = scalar_lea.vmem %s70_s3, 512  ;;  %p1468_p7 = scmp.lt.s32.totalorder %s70_s3, %s70_s3 }
  0x2f   :  { %p1464_p6 = scmp.ne.s32.totalorder %s70_s3, %s1463_s0  ;;  %p1469_p8 = scmp.lt.s32.totalorder %s1463_s0, %s1463_s0 }
  0x31   :  { %p1470_p9 = por %p1469_p8, %p1468_p7 }
  0x33   :  { %p1471_p10 = pnand %p1470_p9, %p1464_p6 }
  0x35   :  { %1474 = shalt.err (!%p1471_p10)
}
  0x36   :  { %75 = dma.hbm_to_vmem [thread:$0]  %s1796_s5, 512, %s70_s3, [#allocation9], %s1506_s11, %s1506_s11, %s1507_s12  }
  0x37   :  { %1495 = dma.done.wait [#allocation3], 256  }
  0x38   :  { %1496 = vsyncadd [#allocation3], 4294967040 }
  0x39   :  { %1497 = dma.done.wait [#allocation6], 288  }
  0x3a   :  { %1498 = vsyncadd [#allocation6], 4294967008 }
  0x3b   :  { %1499 = dma.done.wait [#allocation9], 1024  }
  0x3c   :  { %1500 = vsyncadd [#allocation9], 4294966272  ;;  %v1510_v0 = vmov 0.0   ;;  %vm1511_vm0 = vmmov 0   ;;  %v96_v1 = vld [vmem:[#allocation7 + $0x8] sm:$0xff]  ;;  %v95_v3 = vld [vmem:[#allocation7] sm:$0xff]  ;;  %v191_v10 = vlaneseq }
  0x3d   :  { %1232 = vmatprep.subr.mxu1 %v1510_v0  ;;  %1240 = vmatprep.mubr.msk.f32.mxu1 %vm1511_vm0, %v1510_v0  ;;  %v1585_v2 = vld [vmem:[#allocation8 + $0x18] sm:$0xff]  ;;  %v1588_v4 = vld [vmem:[#allocation8 + $0x10] sm:$0xff]  ;;  %vm104_vm1 = vcmask 130048   ;;  %v94_v6 = vld [vmem:[#allocation2 + $0x8] sm:$0xff]  ;;  %vm196_vm2 = vcmask 261120   ;;  %s1513_s25 = smov 32  }
  0x3e   :  { %1225 = vmatprep.subr.mxu0 %v96_v1  ;;  %1233 = vmatpush3.msra.mxu1 %v1585_v2  ;;  %v93_v5 = vld [vmem:[#allocation2] sm:$0xff]  ;;  %v1592_v7 = vld [vmem:[#allocation8 + $0x8] sm:$0xff]  ;;  %v192_v12 = vand.u32 127, %v191_v10  ;;  %vm1034_vm6 = vcmask 1041408   ;;  %vm1036_vm7 = vcmask 1043456   ;;  %vm1038_vm8 = vcmask 1045504  }
  0x3f   :  { %1226 = vmatpush3.msra.mxu0 %v96_v1  ;;  %1234 = vmatprep.subr.mxu1 %v1510_v0  ;;  %v1595_v8 = vld [vmem:[#allocation8] sm:$0xff]  ;;  %v190_v9 = vld [vmem:[#allocation5] sm:$0x3]  ;;  %v1161_v11 = vld [vmem:[%s1795_s4] ss:$0 sm:$0xff]  ;;  %s1512_s4 = smov 64  }
  0x40   :  { %1227 = vmatprep.subr.mxu0 %v95_v3  ;;  %1235 = vmatpush3.msra.mxu1 %v1588_v4  ;;  %vm193_vm3 = vcmp.ge.s32.totalorder %v192_v12, 64  ;;  %vm194_vm4 = vcmp.lt.s32.totalorder %v192_v12, 96  ;;  %v1045_v19 = vld [vmem:[#allocation10 + $0x10] sm:$0xff]  ;;  %vm1139_vm9 = vcmask 523264   ;;  %s1514_s28 = smov [#allocation11]  }
  0x41   :  { %1228 = vmatpush3.msra.mxu0 %v95_v3  ;;  %1229 = vmatprep.mubr.msk.f32.mxu0 %vm104_vm1, %v93_v5  ;;  %vm1631_vm5 = vmand %vm193_vm3, %vm194_vm4  ;;  %s1147_s29 = sshll.u32 %s1514_s28, 4  ;;  %s1148_s29 = int_to_ptr.vmem [resolvable:$true] %s1147_s29 }
  0x42   :  { %1236 = vmatprep.subr.mxu1 %v1510_v0  ;;  %1230 = vmatmul.mubr.msk.f32.vlgmr.msra.gmra.mxu0 %vm104_vm1, %v94_v6  ;;  %s1475_s30 = scalar_lea.vmem %s1148_s29, 256  ;;  %p1480_p12 = scmp.lt.s32.totalorder %s1148_s29, %s1148_s29 }
  0x43   :  { %1237 = vmatpush3.msra.mxu1 %v1592_v7  ;;  %1243 = vmatprep.subr.mxu0 %v1510_v0  ;;  %p1476_p11 = scmp.ne.s32.totalorder %s1148_s29, %s1475_s30  ;;  %p1481_p13 = scmp.lt.s32.totalorder %s1475_s30, %s1475_s30 }
  0x44   :  { %1238 = vmatprep.subr.mxu1 %v1510_v0  ;;  %1244 = vmatpush3.msra.mxu0 %v1585_v2 }
  0x45   :  { %1239 = vmatpush3.msra.mxu1 %v1595_v8  ;;  %1245 = vmatprep.subr.mxu0 %v1510_v0  ;;  %p1482_p0 = por %p1481_p13, %p1480_p12 }
  0x46   :  { %1241 = vmatmul.mubr.msk.f32.vlgmr.msra.gmra.mxu1 %vm196_vm2, %v190_v9  ;;  %1246 = vmatpush3.msra.mxu0 %v1588_v4 }
  0x47   :  { %1247 = vmatprep.subr.mxu0 %v1510_v0  ;;  %1251 = vmatprep.mubr.msk.f32.mxu0 %vm1511_vm0, %v1510_v0  ;;  %p1483_p1 = pnand %p1482_p0, %p1476_p11 }
  0x48   :  { %1248 = vmatpush3.msra.mxu0 %v1592_v7  ;;  %1254 = vmatprep.subr.mxu1 %v1510_v0 }
  0x49   :  { %1249 = vmatprep.subr.mxu0 %v1510_v0  ;;  %1255 = vmatpush3.msra.mxu1 %v1585_v2 }
  0x4a   :  { %1250 = vmatpush3.msra.mxu0 %v1595_v8  ;;  %1256 = vmatprep.subr.mxu1 %v1510_v0 }
  0x4b   :  { %1257 = vmatpush3.msra.mxu1 %v1588_v4  ;;  %1262 = vmatprep.mubr.msk.f32.mxu1 %vm1511_vm0, %v1510_v0 }
  0x4c   :  { %1258 = vmatprep.subr.mxu1 %v1510_v0  ;;  %1265 = vmatprep.subr.mxu0 %v1510_v0 }
  0x4d   :  { %1259 = vmatpush3.msra.mxu1 %v1592_v7 }
  0x4e   :  { %1260 = vmatprep.subr.mxu1 %v1510_v0 }
  0x4f   :  { %1261 = vmatpush3.msra.mxu1 %v1595_v8 }
  0x50   :  { %1276 = vmatprep.subr.mxu1 %v1510_v0 }
 0x102   :  { %v1231_v13 = vpop.f32.mrf.mxu0 }
 0x103   :  { %v1626_v14 = vadd.f32 %v1231_v13, %v1161_v11 }
 0x104   :  { %v177_v15 = vpop.f32.mrf.mxu0 }
 0x105   :  { %v1628_v16 = vadd.f32 %v1161_v11, %v177_v15 }
 0x106   :  { %v266_v17 = vpop.f32.mrf.mxu1 }
 0x107   :  { %v270_v18 = vadd.f32 %v266_v17, %v1628_v16 }
 0x108   :  { %v1242_v20 = vpop.f32.mrf.mxu1 }
 0x109   :  { %v271_v21 = vmul.f32 0.5, %v270_v18 }
 0x10b   :  { %v272_v22 = vsel %vm1631_vm5, %v270_v18, %v271_v21 }
 0x10c   :  { %1343 = vtanh.f32 %v272_v22 }
 0x119   :  { %v1344_v23 = vpop.eup %1343 }
 0x11a   :  { %v274_v24 = vmul.f32 0.5, %v1344_v23 }
 0x11c   :  { %v275_v25 = vadd.f32 0.5, %v274_v24 }
 0x11e   :  { %v276_v26 = vsel %vm1631_vm5, %v1344_v23, %v275_v25 }
 0x11f   :  { %282 = vrot.lane.b32.xlu0 %v276_v26, %s1512_s4 }
 0x123   :  { %277 = vrot.lane.b32.xlu0 %v190_v9, %s1513_s25 }
 0x191   :  { %v283_v27 = vpop.permute.xlu0 %282 }
 0x192   :  { %v285_v28 = vmul.f32 %v283_v27, %v276_v26 }
 0x194   :  { %287 = vrot.lane.b32.xlu1 %v285_v28, %s1513_s25 }
 0x195   :  { %v278_v29 = vpop.permute.xlu0 %277 }
 0x196   :  { %v280_v30 = vmul.f32 %v278_v29, %v276_v26 }
 0x206   :  { %v288_v31 = vpop.permute.xlu1 %287 }
 0x207   :  { %v290_v32 = vadd.f32 %v288_v31, %v280_v30 }
 0x209   :  { %1345 = vtanh.f32 %v290_v32  ;;  %v383_v49 = vrot.slane %v290_v32, 6 }
 0x216   :  { %v1346_v33 = vpop.eup %1345 }
 0x217   :  { %293 = vrot.lane.b32.xlu1 %v1346_v33, %s1512_s4 }
 0x289   :  { %v294_v34 = vpop.permute.xlu1 %293 }
 0x28a   :  { %v1643_v35 = vmul.f32 %v294_v34, %v276_v26 }
 0x28c   :  { %298 = vrot.lane.b32.xlu0 %v1643_v35, %s1513_s25 }
 0x2fe   :  { %v299_v36 = vpop.permute.xlu0 %298 }
 0x2ff   :  { %1252 = vmatmul.mubr.msk.f32.vlgmr.msra.gmra.mxu0 %vm196_vm2, %v299_v36 }
 0x300   :  { %1266 = vmatpush3.msra.mxu0 %v1585_v2  ;;  %1273 = vmatprep.mubr.msk.f32.mxu0 %vm1511_vm0, %v1510_v0 }
 0x301   :  { %1267 = vmatprep.subr.mxu0 %v1510_v0 }
 0x302   :  { %1268 = vmatpush3.msra.mxu0 %v1588_v4 }
 0x303   :  { %1269 = vmatprep.subr.mxu0 %v1510_v0 }
 0x304   :  { %1270 = vmatpush3.msra.mxu0 %v1592_v7 }
 0x305   :  { %1271 = vmatprep.subr.mxu0 %v1510_v0 }
 0x306   :  { %1272 = vmatpush3.msra.mxu0 %v1595_v8 }
 0x307   :  { %1287 = vmatprep.subr.mxu0 %v1510_v0 }
 0x3bf   :  { %v368_v37 = vpop.f32.mrf.mxu0 }
 0x3c0   :  { %v373_v38 = vrot.slane %v368_v37, 6 }
 0x3c1   :  { %v1253_v39 = vpop.f32.mrf.mxu0 }
 0x3c2   :  { %v375_v40 = vadd.f32 %v373_v38, %v1628_v16 }
 0x3c4   :  { %v376_v41 = vmul.f32 0.5, %v375_v40 }
 0x3c6   :  { %v377_v42 = vsel %vm1631_vm5, %v375_v40, %v376_v41 }
 0x3c7   :  { %1347 = vtanh.f32 %v377_v42 }
 0x3d4   :  { %v1348_v43 = vpop.eup %1347 }
 0x3d5   :  { %v379_v44 = vmul.f32 0.5, %v1348_v43 }
 0x3d7   :  { %v380_v45 = vadd.f32 0.5, %v379_v44 }
 0x3d9   :  { %v381_v46 = vsel %vm1631_vm5, %v1348_v43, %v380_v45 }
 0x3da   :  { %387 = vrot.lane.b32.xlu1 %v381_v46, %s1512_s4  ;;  %v385_v50 = vmul.f32 %v383_v49, %v381_v46 }
 0x44c   :  { %v388_v47 = vpop.permute.xlu1 %387 }
 0x44d   :  { %v390_v48 = vmul.f32 %v388_v47, %v381_v46 }
 0x44f   :  { %392 = vrot.lane.b32.xlu0 %v390_v48, %s1513_s25 }
 0x4c1   :  { %v393_v51 = vpop.permute.xlu0 %392 }
 0x4c2   :  { %v395_v52 = vadd.f32 %v393_v51, %v385_v50 }
 0x4c4   :  { %1349 = vtanh.f32 %v395_v52  ;;  %v489_v11 = vrot.slane %v395_v52, 6 }
 0x4d1   :  { %v1350_v53 = vpop.eup %1349 }
 0x4d2   :  { %398 = vrot.lane.b32.xlu1 %v1350_v53, %s1512_s4 }
 0x544   :  { %v399_v54 = vpop.permute.xlu1 %398 }
 0x545   :  { %v401_v55 = vmul.f32 %v399_v54, %v381_v46 }
 0x547   :  { %v403_v56 = vrot.slane %v401_v55, 2  ;;  %v1035_v21 = vsel %vm1034_vm6, %v1643_v35, %v401_v55 }
 0x549   :  { %404 = vrot.lane.b32.xlu0 %v403_v56, %s1513_s25 }
 0x5bb   :  { %v405_v57 = vpop.permute.xlu0 %404 }
 0x5bc   :  { %1263 = vmatmul.mubr.msk.f32.vlgmr.msra.gmra.mxu1 %vm196_vm2, %v405_v57 }
 0x5bd   :  { %1277 = vmatpush3.msra.mxu1 %v1585_v2  ;;  %1284 = vmatprep.mubr.msk.f32.mxu1 %vm1511_vm0, %v1510_v0 }
 0x5be   :  { %1278 = vmatprep.subr.mxu1 %v1510_v0 }
 0x5bf   :  { %1279 = vmatpush3.msra.mxu1 %v1588_v4 }
 0x5c0   :  { %1280 = vmatprep.subr.mxu1 %v1510_v0 }
 0x5c1   :  { %1281 = vmatpush3.msra.mxu1 %v1592_v7 }
 0x5c2   :  { %1282 = vmatprep.subr.mxu1 %v1510_v0 }
 0x5c3   :  { %1283 = vmatpush3.msra.mxu1 %v1595_v8 }
 0x5c4   :  { %1298 = vmatprep.subr.mxu1 %v1510_v0 }
 0x67c   :  { %v474_v58 = vpop.f32.mrf.mxu1 }
 0x67d   :  { %v479_v59 = vrot.slane %v474_v58, 4 }
 0x67e   :  { %v1264_v60 = vpop.f32.mrf.mxu1 }
 0x67f   :  { %v481_v61 = vadd.f32 %v479_v59, %v1628_v16 }
 0x681   :  { %v482_v62 = vmul.f32 0.5, %v481_v61 }
 0x683   :  { %v483_v63 = vsel %vm1631_vm5, %v481_v61, %v482_v62 }
 0x684   :  { %1351 = vtanh.f32 %v483_v63 }
 0x691   :  { %v1352_v1 = vpop.eup %1351 }
 0x692   :  { %v485_v3 = vmul.f32 0.5, %v1352_v1 }
 0x694   :  { %v486_v5 = vadd.f32 0.5, %v485_v3 }
 0x696   :  { %v487_v6 = vsel %vm1631_vm5, %v1352_v1, %v486_v5 }
 0x697   :  { %493 = vrot.lane.b32.xlu1 %v487_v6, %s1512_s4  ;;  %v491_v12 = vmul.f32 %v489_v11, %v487_v6 }
 0x709   :  { %v494_v9 = vpop.permute.xlu1 %493 }
 0x70a   :  { %v496_v10 = vmul.f32 %v494_v9, %v487_v6 }
 0x70c   :  { %498 = vrot.lane.b32.xlu0 %v496_v10, %s1513_s25 }
 0x77e   :  { %v499_v13 = vpop.permute.xlu0 %498 }
 0x77f   :  { %v501_v15 = vadd.f32 %v499_v13, %v491_v12 }
 0x781   :  { %1353 = vtanh.f32 %v501_v15  ;;  %v595_v37 = vrot.slane %v501_v15, 6 }
 0x78e   :  { %v1354_v17 = vpop.eup %1353 }
 0x78f   :  { %504 = vrot.lane.b32.xlu1 %v1354_v17, %s1512_s4 }
 0x801   :  { %v505_v18 = vpop.permute.xlu1 %504 }
 0x802   :  { %v507_v20 = vmul.f32 %v505_v18, %v487_v6 }
 0x804   :  { %v509_v22 = vrot.slane %v507_v20, 4  ;;  %v1037_v23 = vsel %vm1036_vm7, %v1035_v21, %v507_v20 }
 0x806   :  { %510 = vrot.lane.b32.xlu0 %v509_v22, %s1513_s25 }
 0x878   :  { %v511_v24 = vpop.permute.xlu0 %510 }
 0x879   :  { %1274 = vmatmul.mubr.msk.f32.vlgmr.msra.gmra.mxu0 %vm196_vm2, %v511_v24 }
 0x87a   :  { %1288 = vmatpush3.msra.mxu0 %v1585_v2  ;;  %1295 = vmatprep.mubr.msk.f32.mxu0 %vm1511_vm0, %v1510_v0 }
 0x87b   :  { %1289 = vmatprep.subr.mxu0 %v1510_v0 }
 0x87c   :  { %1290 = vmatpush3.msra.mxu0 %v1588_v4 }
 0x87d   :  { %1291 = vmatprep.subr.mxu0 %v1510_v0 }
 0x87e   :  { %1292 = vmatpush3.msra.mxu0 %v1592_v7 }
 0x87f   :  { %1293 = vmatprep.subr.mxu0 %v1510_v0 }
 0x880   :  { %1294 = vmatpush3.msra.mxu0 %v1595_v8 }
 0x881   :  { %1309 = vmatprep.subr.mxu0 %v1510_v0 }
 0x939   :  { %v580_v25 = vpop.f32.mrf.mxu0 }
 0x93a   :  { %v585_v26 = vrot.slane %v580_v25, 2 }
 0x93b   :  { %v1275_v27 = vpop.f32.mrf.mxu0 }
 0x93c   :  { %v587_v28 = vadd.f32 %v585_v26, %v1628_v16 }
 0x93e   :  { %v588_v29 = vmul.f32 0.5, %v587_v28 }
 0x940   :  { %v589_v30 = vsel %vm1631_vm5, %v587_v28, %v588_v29 }
 0x941   :  { %1355 = vtanh.f32 %v589_v30 }
 0x94e   :  { %v1356_v31 = vpop.eup %1355 }
 0x94f   :  { %v591_v32 = vmul.f32 0.5, %v1356_v31 }
 0x951   :  { %v592_v33 = vadd.f32 0.5, %v591_v32 }
 0x953   :  { %v593_v34 = vsel %vm1631_vm5, %v1356_v31, %v592_v33 }
 0x954   :  { %599 = vrot.lane.b32.xlu1 %v593_v34, %s1512_s4  ;;  %v597_v38 = vmul.f32 %v595_v37, %v593_v34 }
 0x9c6   :  { %v600_v35 = vpop.permute.xlu1 %599 }
 0x9c7   :  { %v602_v36 = vmul.f32 %v600_v35, %v593_v34 }
 0x9c9   :  { %604 = vrot.lane.b32.xlu0 %v602_v36, %s1513_s25 }
 0xa3b   :  { %v605_v16 = vpop.permute.xlu0 %604 }
 0xa3c   :  { %v607_v39 = vadd.f32 %v605_v16, %v597_v38 }
 0xa3e   :  { %1357 = vtanh.f32 %v607_v39  ;;  %v698_v57 = vrot.slane %v607_v39, 6 }
 0xa4b   :  { %v1358_v40 = vpop.eup %1357 }
 0xa4c   :  { %610 = vrot.lane.b32.xlu1 %v1358_v40, %s1512_s4 }
 0xabe   :  { %v611_v41 = vpop.permute.xlu1 %610 }
 0xabf   :  { %v613_v42 = vmul.f32 %v611_v41, %v593_v34 }
 0xac1   :  { %v615_v43 = vrot.slane %v613_v42, 6  ;;  %v1710_v44 = vsel %vm1038_vm8, %v1037_v23, %v613_v42 }
 0xac3   :  { %616 = vrot.lane.b32.xlu0 %v615_v43, %s1513_s25 }
 0xb35   :  { %v617_v45 = vpop.permute.xlu0 %616 }
 0xb36   :  { %1285 = vmatmul.mubr.msk.f32.vlgmr.msra.gmra.mxu1 %vm196_vm2, %v617_v45 }
 0xb37   :  { %1299 = vmatpush3.msra.mxu1 %v1585_v2  ;;  %1306 = vmatprep.mubr.msk.f32.mxu1 %vm1511_vm0, %v1510_v0 }
 0xb38   :  { %1300 = vmatprep.subr.mxu1 %v1510_v0 }
 0xb39   :  { %1301 = vmatpush3.msra.mxu1 %v1588_v4 }
 0xb3a   :  { %1302 = vmatprep.subr.mxu1 %v1510_v0 }
 0xb3b   :  { %1303 = vmatpush3.msra.mxu1 %v1592_v7 }
 0xb3c   :  { %1304 = vmatprep.subr.mxu1 %v1510_v0 }
 0xb3d   :  { %1305 = vmatpush3.msra.mxu1 %v1595_v8 }
 0xbf6   :  { %v686_v46 = vpop.f32.mrf.mxu1 }
 0xbf7   :  { %v690_v47 = vadd.f32 %v686_v46, %v1626_v14 }
 0xbf8   :  { %v1286_v48 = vpop.f32.mrf.mxu1 }
 0xbf9   :  { %v691_v49 = vmul.f32 0.5, %v690_v47 }
 0xbfb   :  { %v692_v50 = vsel %vm1631_vm5, %v690_v47, %v691_v49 }
 0xbfc   :  { %1359 = vtanh.f32 %v692_v50 }
 0xc09   :  { %v1360_v51 = vpop.eup %1359 }
 0xc0a   :  { %v694_v52 = vmul.f32 0.5, %v1360_v51 }
 0xc0c   :  { %v695_v53 = vadd.f32 0.5, %v694_v52 }
 0xc0e   :  { %v696_v54 = vsel %vm1631_vm5, %v1360_v51, %v695_v53 }
 0xc0f   :  { %702 = vrot.lane.b32.xlu1 %v696_v54, %s1512_s4  ;;  %v700_v58 = vmul.f32 %v698_v57, %v696_v54 }
 0xc81   :  { %v703_v55 = vpop.permute.xlu1 %702 }
 0xc82   :  { %v705_v56 = vmul.f32 %v703_v55, %v696_v54 }
 0xc84   :  { %707 = vrot.lane.b32.xlu0 %v705_v56, %s1513_s25 }
 0xcf6   :  { %v708_v59 = vpop.permute.xlu0 %707 }
 0xcf7   :  { %v710_v60 = vadd.f32 %v708_v59, %v700_v58 }
 0xcf9   :  { %1361 = vtanh.f32 %v710_v60  ;;  %v803_v13 = vrot.slane %v710_v60, 6 }
 0xd06   :  { %v1362_v61 = vpop.eup %1361 }
 0xd07   :  { %713 = vrot.lane.b32.xlu1 %v1362_v61, %s1512_s4 }
 0xd79   :  { %v714_v62 = vpop.permute.xlu1 %713 }
 0xd7a   :  { %v1731_v63 = vmul.f32 %v714_v62, %v696_v54 }
 0xd7c   :  { %718 = vrot.lane.b32.xlu0 %v1731_v63, %s1513_s25 }
 0xdee   :  { %v719_v1 = vpop.permute.xlu0 %718 }
 0xdef   :  { %1296 = vmatmul.mubr.msk.f32.vlgmr.msra.gmra.mxu0 %vm196_vm2, %v719_v1  ;;  %v1046_v1 = vld [vmem:[#allocation10 + $0x18] sm:$0xff] }
 0xdf0   :  { %1310 = vmatpush3.msra.mxu0 %v1585_v2  ;;  %1317 = vmatprep.mubr.msk.f32.mxu0 %vm1511_vm0, %v1510_v0 }
 0xdf1   :  { %1311 = vmatprep.subr.mxu0 %v1510_v0  ;;  %1320 = vmatprep.subr.mxu1 %v1046_v1 }
 0xdf2   :  { %1312 = vmatpush3.msra.mxu0 %v1588_v4 }
 0xdf3   :  { %1313 = vmatprep.subr.mxu0 %v1510_v0 }
 0xdf4   :  { %1314 = vmatpush3.msra.mxu0 %v1592_v7 }
 0xdf5   :  { %1315 = vmatprep.subr.mxu0 %v1510_v0 }
 0xdf6   :  { %1316 = vmatpush3.msra.mxu0 %v1595_v8 }
 0xeaf   :  { %v788_v3 = vpop.f32.mrf.mxu0 }
 0xeb0   :  { %v793_v5 = vrot.slane %v788_v3, 6  ;;  %v1044_v3 = vld [vmem:[#allocation10 + $0x8] sm:$0xff] }
 0xeb1   :  { %v1297_v6 = vpop.f32.mrf.mxu0 }
 0xeb2   :  { %v795_v2 = vadd.f32 %v793_v5, %v1626_v14  ;;  %v1043_v5 = vld [vmem:[#allocation10] sm:$0xff] }
 0xeb4   :  { %v796_v9 = vmul.f32 0.5, %v795_v2 }
 0xeb6   :  { %v797_v10 = vsel %vm1631_vm5, %v795_v2, %v796_v9 }
 0xeb7   :  { %1363 = vtanh.f32 %v797_v10 }
 0xec4   :  { %v1364_v11 = vpop.eup %1363 }
 0xec5   :  { %v799_v4 = vmul.f32 0.5, %v1364_v11 }
 0xec7   :  { %v800_v12 = vadd.f32 0.5, %v799_v4 }
 0xec9   :  { %v801_v7 = vsel %vm1631_vm5, %v1364_v11, %v800_v12  ;;  %v1172_v11 = vld [vmem:[%s1797_s6] ss:$0 sm:$0xff] }
 0xeca   :  { %807 = vrot.lane.b32.xlu1 %v801_v7, %s1512_s4  ;;  %v805_v15 = vmul.f32 %v803_v13, %v801_v7 }
 0xf3c   :  { %v808_v0 = vpop.permute.xlu1 %807 }
 0xf3d   :  { %v810_v8 = vmul.f32 %v808_v0, %v801_v7 }
 0xf3f   :  { %812 = vrot.lane.b32.xlu0 %v810_v8, %s1513_s25 }
 0xfb1   :  { %v813_v17 = vpop.permute.xlu0 %812 }
 0xfb2   :  { %v815_v18 = vadd.f32 %v813_v17, %v805_v15 }
 0xfb4   :  { %1365 = vtanh.f32 %v815_v18  ;;  %v909_v37 = vrot.slane %v815_v18, 6 }
 0xfc1   :  { %v1366_v20 = vpop.eup %1365 }
 0xfc2   :  { %818 = vrot.lane.b32.xlu1 %v1366_v20, %s1512_s4 }
0x1034   :  { %v819_v21 = vpop.permute.xlu1 %818 }
0x1035   :  { %v821_v22 = vmul.f32 %v819_v21, %v801_v7 }
0x1037   :  { %v823_v23 = vrot.slane %v821_v22, 2  ;;  %v1040_v43 = vsel %vm1034_vm6, %v1731_v63, %v821_v22 }
0x1039   :  { %824 = vrot.lane.b32.xlu0 %v823_v23, %s1513_s25 }
0x10ab   :  { %v825_v24 = vpop.permute.xlu0 %824 }
0x10ac   :  { %1307 = vmatmul.mubr.msk.f32.vlgmr.msra.gmra.mxu1 %vm196_vm2, %v825_v24 }
0x10ad   :  { %1321 = vmatpush3.msra.mxu1 %v1046_v1 }
0x10ae   :  { %1322 = vmatprep.subr.mxu1 %v1045_v19 }
0x10af   :  { %1323 = vmatpush3.msra.mxu1 %v1045_v19 }
0x10b0   :  { %1324 = vmatprep.subr.mxu1 %v1044_v3 }
0x10b1   :  { %1325 = vmatpush3.msra.mxu1 %v1044_v3 }
0x10b2   :  { %1326 = vmatprep.subr.mxu1 %v1043_v5 }
0x10b3   :  { %1327 = vmatpush3.msra.mxu1 %v1043_v5 }
0x116c   :  { %v894_v25 = vpop.f32.mrf.mxu1 }
0x116d   :  { %v899_v26 = vrot.slane %v894_v25, 4 }
0x116e   :  { %v1308_v27 = vpop.f32.mrf.mxu1 }
0x116f   :  { %v901_v28 = vadd.f32 %v899_v26, %v1626_v14 }
0x1171   :  { %v902_v29 = vmul.f32 0.5, %v901_v28 }
0x1173   :  { %v903_v30 = vsel %vm1631_vm5, %v901_v28, %v902_v29 }
0x1174   :  { %1367 = vtanh.f32 %v903_v30 }
0x1181   :  { %v1368_v31 = vpop.eup %1367 }
0x1182   :  { %v905_v32 = vmul.f32 0.5, %v1368_v31 }
0x1184   :  { %v906_v33 = vadd.f32 0.5, %v905_v32 }
0x1186   :  { %v907_v34 = vsel %vm1631_vm5, %v1368_v31, %v906_v33 }
0x1187   :  { %913 = vrot.lane.b32.xlu1 %v907_v34, %s1512_s4  ;;  %v911_v38 = vmul.f32 %v909_v37, %v907_v34 }
0x11f9   :  { %v914_v35 = vpop.permute.xlu1 %913 }
0x11fa   :  { %v916_v36 = vmul.f32 %v914_v35, %v907_v34 }
0x11fc   :  { %918 = vrot.lane.b32.xlu0 %v916_v36, %s1513_s25 }
0x126e   :  { %v919_v16 = vpop.permute.xlu0 %918 }
0x126f   :  { %v921_v39 = vadd.f32 %v919_v16, %v911_v38 }
0x1271   :  { %1369 = vtanh.f32 %v921_v39 }
0x127e   :  { %v1370_v40 = vpop.eup %1369 }
0x127f   :  { %924 = vrot.lane.b32.xlu1 %v1370_v40, %s1512_s4 }
0x12f1   :  { %v925_v41 = vpop.permute.xlu1 %924 }
0x12f2   :  { %v927_v42 = vmul.f32 %v925_v41, %v907_v34 }
0x12f4   :  { %v929_v45 = vrot.slane %v927_v42, 4  ;;  %v1041_v46 = vsel %vm1036_vm7, %v1040_v43, %v927_v42 }
0x12f6   :  { %930 = vrot.lane.b32.xlu0 %v929_v45, %s1513_s25 }
0x1368   :  { %v931_v47 = vpop.permute.xlu0 %930 }
0x1369   :  { %1318 = vmatmul.mubr.msk.f32.vlgmr.msra.gmra.mxu0 %vm196_vm2, %v931_v47 }
0x1429   :  { %v1000_v48 = vpop.f32.mrf.mxu0 }
0x142a   :  { %v1005_v49 = vrot.slane %v1000_v48, 2 }
0x142b   :  { %v1319_v50 = vpop.f32.mrf.mxu0 }
0x142c   :  { %v1007_v51 = vadd.f32 %v1005_v49, %v1626_v14  ;;  %v1015_v14 = vrot.slane %v921_v39, 6 }
0x142e   :  { %v1008_v52 = vmul.f32 0.5, %v1007_v51 }
0x1430   :  { %v1009_v53 = vsel %vm1631_vm5, %v1007_v51, %v1008_v52 }
0x1431   :  { %1371 = vtanh.f32 %v1009_v53 }
0x143e   :  { %v1372_v54 = vpop.eup %1371 }
0x143f   :  { %v1011_v55 = vmul.f32 0.5, %v1372_v54 }
0x1441   :  { %v1012_v56 = vadd.f32 0.5, %v1011_v55 }
0x1443   :  { %v1013_v57 = vsel %vm1631_vm5, %v1372_v54, %v1012_v56 }
0x1444   :  { %1019 = vrot.lane.b32.xlu1 %v1013_v57, %s1512_s4  ;;  %v1017_v60 = vmul.f32 %v1015_v14, %v1013_v57 }
0x14b6   :  { %v1020_v58 = vpop.permute.xlu1 %1019 }
0x14b7   :  { %v1022_v59 = vmul.f32 %v1020_v58, %v1013_v57 }
0x14b9   :  { %1024 = vrot.lane.b32.xlu0 %v1022_v59, %s1513_s25 }
0x14bd   :  { %1056 = vrot.lane.b32.xlu0 %v1710_v44, %s1513_s25 }
0x152b   :  { %v1025_v61 = vpop.permute.xlu0 %1024 }
0x152c   :  { %v1027_v62 = vadd.f32 %v1025_v61, %v1017_v60 }
0x152e   :  { %1373 = vtanh.f32 %v1027_v62 }
0x152f   :  { %v1057_v63 = vpop.permute.xlu0 %1056 }
0x1530   :  { %1328 = vmatprep.mubr.msk.f32.mxu1 %vm196_vm2, %v1057_v63 }
0x153b   :  { %v1374_v44 = vpop.eup %1373 }
0x153c   :  { %1030 = vrot.lane.b32.xlu1 %v1374_v44, %s1512_s4 }
0x15ae   :  { %v1031_v6 = vpop.permute.xlu1 %1030 }
0x15af   :  { %v1033_v2 = vmul.f32 %v1031_v6, %v1013_v57 }
0x15b1   :  { %v1042_v9 = vsel %vm1038_vm8, %v1041_v46, %v1033_v2 }
0x15b2   :  { %1058 = vrot.lane.b32.xlu1 %v1042_v9, %s1513_s25 }
0x1624   :  { %v1059_v10 = vpop.permute.xlu1 %1058 }
0x1625   :  { %1329 = vmatmul.mubr.msk.f32.vlgmr.msra.gmra.mxu1 %vm196_vm2, %v1059_v10 }
0x16e5   :  { %v1330_v4 = vpop.f32.mrf.mxu1 }
0x16e6   :  { %v1136_v12 = vadd.f32 %v1330_v4, %v1172_v11 }
0x16e7   :  { %v1130_v7 = vpop.f32.mrf.mxu1 }
0x16e8   :  { %v1131_v0 = vadd.f32 %v1172_v11, %v1130_v7  ;;  %1141 = vst.msk [vmem:[#allocation11 + $0x8] sm:$0xff] %vm1139_vm9, %v1136_v12 }
0x16ea   :  { %1140 = vst.msk [vmem:[#allocation11] sm:$0xff] %vm1139_vm9, %v1131_v0 }
0x16eb   :  { %1486 = shalt.err (!%p1483_p1)
}
0x16ec   :  { %1153 = dma.vmem_to_hbm [thread:$0]  %s1148_s29, 256, %s1798_s7, [#allocation4], %s1506_s11, %s1506_s11, %s1507_s12  }
0x16ed   :  { %1501 = dma.done.wait [#allocation4], 256  }
0x16ee   :  { %1502 = vsyncadd [#allocation4], 4294967040 }
0x16ef   :  { %1157 = vsyncpa [#allocation3], 1 }
0x16f0   :  { %1158 = vsyncpa [#allocation6], 1 }
0x16f1   :  { %1159 = vsyncpa [#allocation9], 1 }
0x16f2   :  { %1160 = vsyncpa [#allocation4], 1 }

</bundles_post_ra>
